<compile_context>
chip_gen: v6e
topology: v6e:2x2x1
jax: 0.10.0
libtpu: 0.0.40
codegen_flags: <defaults>
</compile_context>

<pallas_src>
import jax
import jax.numpy as jnp
from jax.experimental import pallas as pl
from jax.experimental.pallas import tpu as pltpu


# --------------------------------------------------------------------------- #
# Pallas kernel: FM cross term + sigmoid on a (F, TB, D) tile.
# --------------------------------------------------------------------------- #
def fm_cross_kernel(x_ref, o_ref):
    # x_ref: (F, TB, D)  — field axis leading, batch tile on sublanes, D on lanes
    # o_ref: (TB, 1)     — sigmoid(FM cross) column
    num_fields = x_ref.shape[0]

    x0 = x_ref[0].astype(jnp.float32)          # (TB, D)
    s = x0                                      # running sum over fields
    ssq = x0 * x0                               # running sum of squares
    for f in range(1, num_fields):              # F is small & static -> unrolled
        xf = x_ref[f].astype(jnp.float32)
        s = s + xf
        ssq = ssq + xf * xf

    diff = s * s - ssq                          # (TB, D)  square_of_sum - sum_of_square
    cross = jnp.sum(diff, axis=-1, keepdims=True)   # (TB, 1) lane reduce
    o_ref[...] = jax.nn.sigmoid(cross)


def fm_cross_sigmoid(feature_embs_fbd, *, tb_target=8192):
    """Pallas call: (F, B, D) float -> (B,) float32 == sigmoid(FMcross)."""
    F, B, D = feature_embs_fbd.shape
    # Large batch tile (per-row footprint is F*D*4 bytes); double-buffered this
    # stays well under the default scoped VMEM limit on v5e/v6e/v7x.
    tb = min(B, tb_target)
    grid = (pl.cdiv(B, tb),)

    out = pl.pallas_call(
        fm_cross_kernel,
        out_shape=jax.ShapeDtypeStruct((B, 1), jnp.float32),
        grid_spec=pltpu.PrefetchScalarGridSpec(
            num_scalar_prefetch=0,
            grid=grid,
            in_specs=[pl.BlockSpec((F, tb, D), lambda b: (0, b, 0))],
            out_specs=pl.BlockSpec((tb, 1), lambda b: (b, 0)),
        ),
        compiler_params=pltpu.CompilerParams(
            dimension_semantics=("parallel",),
        ),
    )(feature_embs_fbd)
    return out[:, 0]


# --------------------------------------------------------------------------- #
# Plain-JAX glue reproducing FM.forward semantics.
# --------------------------------------------------------------------------- #
def _max_norm_rows(rows, max_norm=1.0, eps=1e-7):
    """Emulate nn.Embedding(max_norm=1) lookup-time renorm on GATHERED rows only."""
    norms = jnp.sqrt(jnp.sum(rows * rows, axis=-1, keepdims=True))
    scale = jnp.where(norms > max_norm, max_norm / (norms + eps), 1.0)
    return rows * scale


def fm_forward(u, i, user_table, item_feat_table, item_df):
    """Reproduces FM.forward: gather user + item-feature embeddings, FM cross, sigmoid.

    u: (B,) int32 user ids
    i: (B,) int32 item ids
    user_table: (n_users, dim) float32
    item_feat_table: (n_feat_vocab, dim) float32
    item_df: (n_items, n_item_feats) int32 feature indices per item
    """
    item_feature_indexes = item_df[i]                               # (B, n_item_feats)
    user_rows = _max_norm_rows(user_table[u])                       # (B, dim)
    item_rows = _max_norm_rows(item_feat_table[item_feature_indexes])  # (B, nF, dim)

    # Build the (F, B, D) layout directly (F = 1 + n_item_feats).
    all_feats = jnp.concatenate(
        [user_rows[None, :, :], jnp.transpose(item_rows, (1, 0, 2))], axis=0
    ).astype(jnp.float32)                                           # (F, B, dim)

    return fm_cross_sigmoid(all_feats)


# --------------------------------------------------------------------------- #
# Self-test.
# --------------------------------------------------------------------------- #
if __name__ == "__main__":
    key = jax.random.PRNGKey(0)
    k1, k2, k3, k4, k5 = jax.random.split(key, 5)

    # Small deterministic synthetic setup consistent with the module.
    n_users = 10
    n_items = 6
    n_item_feats = 3        # columns in item_df
    feat_vocab = 12         # item_df.values.max() + 1
    dim = 32
    batch = 8

    item_df = jax.random.randint(k1, (n_items, n_item_feats), 0, feat_vocab, dtype=jnp.int32)
    user_table = jax.random.normal(k2, (n_users, dim), dtype=jnp.float32)
    item_feat_table = jax.random.normal(k3, (feat_vocab, dim), dtype=jnp.float32)

    u = jax.random.randint(k4, (batch,), 0, n_users, dtype=jnp.int32)
    i = jax.random.randint(k5, (batch,), 0, n_items, dtype=jnp.int32)

    logit = fm_forward(u, i, user_table, item_feat_table, item_df)
    jax.block_until_ready(logit)

    # Pure-JAX reference of the whole forward (same semantics as the torch module).
    def ref_forward(u, i):
        item_feature_indexes = item_df[i]
        user_feats = _max_norm_rows(user_table[u])[:, None, :]          # (B, 1, dim)
        item_feats = _max_norm_rows(item_feat_table[item_feature_indexes])  # (B, nF, dim)
        x = jnp.concatenate([user_feats, item_feats], axis=1)           # (B, F, dim)
        square_of_sum = jnp.sum(x, axis=1) ** 2
        sum_of_square = jnp.sum(x ** 2, axis=1)
        out = jnp.sum(square_of_sum - sum_of_square, axis=1)
        return jax.nn.sigmoid(out)

    ref = ref_forward(u, i)
    assert logit.shape == (batch,), logit.shape
    assert jnp.allclose(logit, ref, atol=1e-5, rtol=1e-5), (logit, ref)

    print("KERNEL_OK")
</pallas_src>

<mosaic_0001>
module attributes {stable_mosaic.version = 11 : i64} {
  func.func @fm_cross_kernel(%arg0: i32, %arg1: memref<4x8x32xf32, #tpu.memory_space<vmem>>, %arg2: memref<8x1xf32, #tpu.memory_space<vmem>>) attributes {dimension_semantics = [#tpu.dimension_semantics<parallel>], iteration_bounds = array<i64: 1>, scalar_prefetch = 0 : i64, scratch_operands = 0 : i64, tpu.core_type = #tpu.core_type<tc>, window_params = [{transform_indices = @transform_0, window_bounds = array<i64: 4, 8, 32>}, {transform_indices = @transform_1, window_bounds = array<i64: 8, 1>}]} {
    %c0 = arith.constant 0 : index
    %c0_0 = arith.constant 0 : index
    %c0_1 = arith.constant 0 : index
    %0 = vector.load %arg1[%c0, %c0_0, %c0_1] : memref<4x8x32xf32, #tpu.memory_space<vmem>>, vector<1x8x32xf32>
    %1 = vector.shape_cast %0 : vector<1x8x32xf32> to vector<8x32xf32>
    %2 = arith.mulf %1, %1 : vector<8x32xf32>
    %c1 = arith.constant 1 : index
    %c0_2 = arith.constant 0 : index
    %c0_3 = arith.constant 0 : index
    %3 = vector.load %arg1[%c1, %c0_2, %c0_3] : memref<4x8x32xf32, #tpu.memory_space<vmem>>, vector<1x8x32xf32>
    %4 = vector.shape_cast %3 : vector<1x8x32xf32> to vector<8x32xf32>
    %5 = arith.addf %1, %4 : vector<8x32xf32>
    %6 = arith.mulf %4, %4 : vector<8x32xf32>
    %7 = arith.addf %2, %6 : vector<8x32xf32>
    %c2 = arith.constant 2 : index
    %c0_4 = arith.constant 0 : index
    %c0_5 = arith.constant 0 : index
    %8 = vector.load %arg1[%c2, %c0_4, %c0_5] : memref<4x8x32xf32, #tpu.memory_space<vmem>>, vector<1x8x32xf32>
    %9 = vector.shape_cast %8 : vector<1x8x32xf32> to vector<8x32xf32>
    %10 = arith.addf %5, %9 : vector<8x32xf32>
    %11 = arith.mulf %9, %9 : vector<8x32xf32>
    %12 = arith.addf %7, %11 : vector<8x32xf32>
    %c3 = arith.constant 3 : index
    %c0_6 = arith.constant 0 : index
    %c0_7 = arith.constant 0 : index
    %13 = vector.load %arg1[%c3, %c0_6, %c0_7] : memref<4x8x32xf32, #tpu.memory_space<vmem>>, vector<1x8x32xf32>
    %14 = vector.shape_cast %13 : vector<1x8x32xf32> to vector<8x32xf32>
    %15 = arith.addf %10, %14 : vector<8x32xf32>
    %16 = arith.mulf %14, %14 : vector<8x32xf32>
    %17 = arith.addf %12, %16 : vector<8x32xf32>
    %18 = arith.mulf %15, %15 : vector<8x32xf32>
    %19 = arith.subf %18, %17 : vector<8x32xf32>
    %cst = arith.constant dense<0.000000e+00> : vector<8xf32>
    %20 = vector.multi_reduction <add>, %19, %cst [1] : vector<8x32xf32> to vector<8xf32>
    %21 = vector.shape_cast %20 : vector<8xf32> to vector<8x1xf32>
    %22 = arith.negf %21 : vector<8x1xf32>
    %23 = math.exp %22 : vector<8x1xf32>
    %cst_8 = arith.constant 1.000000e+00 : f32
    %24 = vector.broadcast %cst_8 : f32 to vector<8x1xf32>
    %25 = arith.addf %24, %23 : vector<8x1xf32>
    %26 = arith.divf %24, %25 : vector<8x1xf32>
    %c0_9 = arith.constant 0 : index
    %c0_10 = arith.constant 0 : index
    %27 = vector.load %arg2[%c0_9, %c0_10] : memref<8x1xf32, #tpu.memory_space<vmem>>, vector<8x1xf32>
    tpu.vector_store %arg2[%c0_9, %c0_10], %26 {strides = array<i32>} : memref<8x1xf32, #tpu.memory_space<vmem>>, vector<8x1xf32>,
    return
  }
  func.func @transform_0(%arg0: i32) -> (i32, i32, i32) {
    %c0_i32 = arith.constant 0 : i32
    %c0_i32_0 = arith.constant 0 : i32
    %c0_i32_1 = arith.constant 0 : i32
    return %c0_i32, %arg0, %c0_i32_0 : i32, i32, i32
  }
  func.func @transform_1(%arg0: i32) -> (i32, i32) {
    %c0_i32 = arith.constant 0 : i32
    %c0_i32_0 = arith.constant 0 : i32
    return %arg0, %c0_i32 : i32, i32
  }
}

</mosaic_0001>

<bundles_post_ra>
// kernel: tpu_custom_call.1
= control target key start
LH: loop header
LB: loop body
LE: loop exit
PB: predicated region body
PF: predicated region fallthrough
CT: control target
= control target key end

     0   :  { %6 = vsyncpa [#allocation3], 0  ;;  %s88_s6 = smov [#allocation2]   ;;  %s107_s0 = inlined_call_operand.hbm [shape: f32[4,8,32], index: 0, kind: input, shape index: {}]   ;;  %s108_s1 = inlined_call_operand.vmem [shape: f32[8,1], index: 1, kind: output, shape index: {}]  }
   0x1   :  { %s12_s7 = sshll.u32 %s88_s6, 4  ;;  %s13_s7 = int_to_ptr.vmem [resolvable:$true] %s12_s7 }
   0x2   :  { %s74_s8 = scalar_lea.vmem %s13_s7, 512  ;;  %p79_p1 = scmp.lt.s32.totalorder %s13_s7, %s13_s7 }
   0x3   :  { %p75_p0 = scmp.ne.s32.totalorder %s13_s7, %s74_s8  ;;  %p80_p2 = scmp.lt.s32.totalorder %s74_s8, %s74_s8 }
   0x5   :  { %p81_p3 = por %p80_p2, %p79_p1 }
   0x7   :  { %p82_p4 = pnand %p81_p3, %p75_p0 }
   0x9   :  { %85 = shalt.err (!%p82_p4)
}
   0xa   :  { %s89_s9 = smov 128   ;;  %s90_s10 = smov 8  }
   0xb   :  { %18 = dma.hbm_to_vmem [thread:$0]  %s107_s0, 512, %s13_s7, [#allocation3], %s89_s9, %s89_s9, %s90_s10  }
   0xc   :  { %86 = dma.done.wait [#allocation3], 512  }
   0xd   :  { %87 = vsyncadd [#allocation3], 4294966784  ;;  %v22_v0 = vld [vmem:[#allocation2] sm:$0xff]  ;;  %v25_v1 = vld [vmem:[#allocation2 + $0x8] sm:$0xff]  ;;  %vm41_vm0 = vcmask 261120   ;;  %vm51_vm1 = vcmask 7168  }
   0xe   :  { %v30_v2 = vld [vmem:[#allocation2 + $0x10] sm:$0xff]  ;;  %v23_v3 = vmul.f32 %v22_v0, %v22_v0  ;;  %v26_v4 = vadd.f32 %v25_v1, %v22_v0  ;;  %v27_v5 = vmul.f32 %v25_v1, %v25_v1  ;;  %v35_v7 = vld [vmem:[#allocation2 + $0x18] sm:$0xff] }
   0xf   :  { %v32_v6 = vmul.f32 %v30_v2, %v30_v2  ;;  %v37_v10 = vmul.f32 %v35_v7, %v35_v7 }
  0x10   :  { %v28_v8 = vadd.f32 %v27_v5, %v23_v3  ;;  %v31_v9 = vadd.f32 %v30_v2, %v26_v4 }
  0x12   :  { %v33_v11 = vadd.f32 %v32_v6, %v28_v8  ;;  %v36_v12 = vadd.f32 %v35_v7, %v31_v9 }
  0x14   :  { %v38_v13 = vadd.f32 %v37_v10, %v33_v11  ;;  %v39_v14 = vmul.f32 %v36_v12, %v36_v12 }
  0x16   :  { %v40_v15 = vsub.f32 %v39_v14, %v38_v13 }
  0x18   :  { %v42_v16 = vsel %vm41_vm0, %v40_v15, 0.0 }
  0x19   :  { %43 = vadd.xlane.f32.xlu0 %v42_v16 }
  0xa2   :  { %v44_v17 = vpop.xlane.xlu0 %43 }
  0xa3   :  { %v58_v18 = vmul.f32 -1.442695, %v44_v17 }
  0xa5   :  { %62 = vpow2.f32 %v58_v18 }
  0xb2   :  { %v63_v19 = vpop.eup %62 }
  0xb3   :  { %v48_v20 = vadd.f32 1.0, %v63_v19 }
  0xb5   :  { %64 = vrcp.f32 %v48_v20 }
  0xc2   :  { %v65_v21 = vpop.eup %64 }
  0xc3   :  { %52 = vst.msk [vmem:[%s108_s1] sm:$0xff] %vm51_vm1, %v65_v21 }
  0xc4   :  { %57 = vsyncpa [#allocation3], 1 }

</bundles_post_ra>
